<compile_context>
chip_gen: v7x
topology: tpu7x:2x2x1
jax: 0.10.0
libtpu: 0.0.40
codegen_flags: <defaults>
</compile_context>

<pallas_src>
import functools

import jax
import jax.numpy as jnp
from jax.experimental import pallas as pl
from jax.experimental.pallas import tpu as pltpu


def _linear_kernel(x_ref, w_ref, b_ref, o_ref):
    # x_ref: (tm, F)   w_ref: (F, C)   b_ref: (1, C)   o_ref: (tm, C)
    acc = jnp.dot(x_ref[...], w_ref[...], preferred_element_type=jnp.float32)
    o_ref[...] = (acc + b_ref[...]).astype(o_ref.dtype)


def _round_up(x, m):
    return ((x + m - 1) // m) * m


@functools.partial(jax.jit, static_argnames=("tile_m", "use_bf16_inputs"))
def predictor_forward(x, w_t, b, *, tile_m=1024, use_bf16_inputs=False):
    """x: (M, F), w_t: (F, C) (= W^T), b: (C,).  Returns (M, C) in x.dtype."""
    M, F = x.shape
    F2, C = w_t.shape
    assert F == F2, "weight / input feature mismatch"
    out_dtype = x.dtype

    # Optionally halve the dominant x-read HBM stream; the MXU takes bf16
    # natively on v5e/v6e/v7x and we still accumulate in f32.
    if use_bf16_inputs:
        x = x.astype(jnp.bfloat16)
        w_t = w_t.astype(jnp.bfloat16)

    # Bias kept in f32 so the add happens on the f32 accumulator.
    b2 = b.reshape(1, C).astype(jnp.float32)

    # Effective batch tile:
    #  - at most `tile_m` (large tiles amortize the ~0.35 us/grid-step overhead
    #    and keep the DMA engine streaming),
    #  - a multiple of 8 (sublane granularity),
    #  - small enough that the grid has >= 2 steps when M permits, so the
    #    "parallel" axis can be split across v7x's two TensorCores.
    tm = min(tile_m, _round_up(pl.cdiv(M, 2), 8))
    tm = max(tm, 8)

    # Ragged batch: pad M up to a multiple of tm, slice the result afterwards.
    M_pad = _round_up(M, tm)
    if M_pad != M:
        x = jnp.pad(x, ((0, M_pad - M), (0, 0)))

    grid = (M_pad // tm,)

    flops = 2 * M_pad * F * C
    bytes_accessed = (
        M_pad * F * x.dtype.itemsize          # x read
        + F * C * w_t.dtype.itemsize          # weight read (once, resident)
        + C * 4                               # bias read
        + M_pad * C * jnp.dtype(out_dtype).itemsize  # output write
    )

    out = pl.pallas_call(
        _linear_kernel,
        out_shape=jax.ShapeDtypeStruct((M_pad, C), out_dtype),
        grid_spec=pltpu.PrefetchScalarGridSpec(
            num_scalar_prefetch=0,
            grid=grid,
            in_specs=[
                pl.BlockSpec((tm, F), lambda i: (i, 0)),   # x tile over batch
                pl.BlockSpec((F, C), lambda i: (0, 0)),    # full weight, resident
                pl.BlockSpec((1, C), lambda i: (0, 0)),    # bias, resident
            ],
            out_specs=pl.BlockSpec((tm, C), lambda i: (i, 0)),
        ),
        compiler_params=pltpu.CompilerParams(
            dimension_semantics=("parallel",),
        ),
        cost_estimate=pl.CostEstimate(
            flops=flops, transcendentals=0, bytes_accessed=bytes_accessed
        ),
    )(x, w_t, b2)

    if M_pad != M:
        out = out[:M]
    return out


if __name__ == "__main__":
    # Small shapes consistent with the module: feature_size=32, num_classes=16, batch=8.
    feature_size = 32
    num_classes = 16
    batch = 8

    key = jax.random.PRNGKey(0)
    k_x, k_w, k_b = jax.random.split(key, 3)

    # Deterministic parameter init (mimics nn.Linear's uniform(-1/sqrt(F), 1/sqrt(F))).
    bound = 1.0 / jnp.sqrt(jnp.float32(feature_size))
    W = jax.random.uniform(k_w, (num_classes, feature_size), jnp.float32, -bound, bound)
    b = jax.random.uniform(k_b, (num_classes,), jnp.float32, -bound, bound)
    x = jax.random.normal(k_x, (batch, feature_size), jnp.float32)

    out = predictor_forward(x, W.T, b)
    out = jax.block_until_ready(out)

    # Reference check against plain JAX.
    ref = x @ W.T + b
    assert out.shape == (batch, num_classes)
    assert jnp.allclose(out, ref, atol=1e-5, rtol=1e-5), "mismatch vs reference"

    # Also exercise a ragged, larger batch to validate padding + multi-step grid.
    x_big = jax.random.normal(k_x, (1000, feature_size), jnp.float32)
    out_big = jax.block_until_ready(predictor_forward(x_big, W.T, b, tile_m=512))
    ref_big = x_big @ W.T + b
    assert out_big.shape == (1000, num_classes)
    assert jnp.allclose(out_big, ref_big, atol=1e-5, rtol=1e-5), "mismatch (big batch)"

    print("KERNEL_OK")
</pallas_src>

<mosaic_0001>
module attributes {stable_mosaic.version = 11 : i64} {
  func.func @_linear_kernel(%arg0: i32, %arg1: memref<8x32xf32, #tpu.memory_space<vmem>>, %arg2: memref<32x16xf32, #tpu.memory_space<vmem>>, %arg3: memref<1x16xf32, #tpu.memory_space<vmem>>, %arg4: memref<8x16xf32, #tpu.memory_space<vmem>>) attributes {dimension_semantics = [#tpu.dimension_semantics<parallel>], iteration_bounds = array<i64: 1>, scalar_prefetch = 0 : i64, scratch_operands = 0 : i64, tpu.core_type = #tpu.core_type<tc>, window_params = [{transform_indices = @transform_0, window_bounds = array<i64: 8, 32>}, {pipeline_mode = #tpu.pipeline_mode<synchronous>, transform_indices = @transform_1, window_bounds = array<i64: 32, 16>}, {pipeline_mode = #tpu.pipeline_mode<synchronous>, transform_indices = @transform_2, window_bounds = array<i64: 1, 16>}, {transform_indices = @transform_3, window_bounds = array<i64: 8, 16>}]} {
    %c0 = arith.constant 0 : index
    %c0_0 = arith.constant 0 : index
    %0 = vector.load %arg1[%c0, %c0_0] : memref<8x32xf32, #tpu.memory_space<vmem>>, vector<8x32xf32>
    %c0_1 = arith.constant 0 : index
    %c0_2 = arith.constant 0 : index
    %1 = vector.load %arg2[%c0_1, %c0_2] : memref<32x16xf32, #tpu.memory_space<vmem>>, vector<32x16xf32>
    %cst = arith.constant dense<0.000000e+00> : vector<8x16xf32>
    %2 = tpu.matmul %0, %1, %cst {dimension_numbers = #tpu.dot_dimension_numbers<[1], [0], [0], [1], [0, 0, 1, 1], [], []>} : vector<8x32xf32>, vector<32x16xf32>, vector<8x16xf32> -> vector<8x16xf32>
    %c0_3 = arith.constant 0 : index
    %c0_4 = arith.constant 0 : index
    %3 = vector.load %arg3[%c0_3, %c0_4] : memref<1x16xf32, #tpu.memory_space<vmem>>, vector<1x16xf32>
    %4 = vector.broadcast %3 : vector<1x16xf32> to vector<8x16xf32>
    %5 = arith.addf %2, %4 : vector<8x16xf32>
    %c0_5 = arith.constant 0 : index
    %c0_6 = arith.constant 0 : index
    %6 = vector.load %arg4[%c0_5, %c0_6] : memref<8x16xf32, #tpu.memory_space<vmem>>, vector<8x16xf32>
    tpu.vector_store %arg4[%c0_5, %c0_6], %5 {strides = array<i32>} : memref<8x16xf32, #tpu.memory_space<vmem>>, vector<8x16xf32>,
    return
  }
  func.func @transform_0(%arg0: i32) -> (i32, i32) {
    %c0_i32 = arith.constant 0 : i32
    %c0_i32_0 = arith.constant 0 : i32
    return %arg0, %c0_i32 : i32, i32
  }
  func.func @transform_1(%arg0: i32) -> (i32, i32) {
    %c0_i32 = arith.constant 0 : i32
    %c0_i32_0 = arith.constant 0 : i32
    %c0_i32_1 = arith.constant 0 : i32
    return %c0_i32, %c0_i32_0 : i32, i32
  }
  func.func @transform_2(%arg0: i32) -> (i32, i32) {
    %c0_i32 = arith.constant 0 : i32
    %c0_i32_0 = arith.constant 0 : i32
    %c0_i32_1 = arith.constant 0 : i32
    return %c0_i32, %c0_i32_0 : i32, i32
  }
  func.func @transform_3(%arg0: i32) -> (i32, i32) {
    %c0_i32 = arith.constant 0 : i32
    %c0_i32_0 = arith.constant 0 : i32
    return %arg0, %c0_i32 : i32, i32
  }
}

</mosaic_0001>

<bundles_post_ra>
// kernel: predictor_forward.1
= control target key start
LH: loop header
LB: loop body
LE: loop exit
PB: predicated region body
PF: predicated region fallthrough
CT: control target
= control target key end

     0   :  { %v169_v3 = vmov 0.0|0.0   ;;  %vm170_vm0 = vmmov 0   ;;  %v171_v6 = vmov 0.0   ;;  %s223_s0 = inlined_call_operand.vmem [shape: f32[8,32], index: 0, kind: input, shape index: {}]   ;;  %s224_s1 = inlined_call_operand.vmem [shape: f32[32,16], index: 1, kind: input, shape index: {}]   ;;  %s225_s2 = inlined_call_operand.vmem [shape: f32[1,16], index: 2, kind: input, shape index: {}]   ;;  %s226_s3 = inlined_call_operand.hbm [shape: f32[8,16], index: 3, kind: output, shape index: {}]  }
   0x1   :  { %v16_v0 = vld [vmem:[%s224_s1] sm:$0xff]  ;;  %v17_v1 = vld [vmem:[%s224_s1 + $0x8] sm:$0xff]  ;;  %v18_v2 = vld [vmem:[%s224_s1 + $0x10] sm:$0xff]  ;;  %135 = vmatprep.subr.bf16.mxu0 %v169_v3  ;;  %132 = vmatprep.mubr.msk.f32.mxu0 %vm170_vm0, %v171_v6 }
   0x2   :  { %v136_v4 = vpack.c.bf16 %v17_v1, %v16_v0  ;;  %v19_v5 = vld [vmem:[%s224_s1 + $0x18] sm:$0xff] }
   0x3   :  { %8 = vsyncpa [#allocation3], 0  ;;  %v139_v7 = vpack.c.bf16 %v19_v5, %v18_v2  ;;  %v15_v8 = vld [vmem:[%s223_s0] sm:$0xff]  ;;  %vm27_vm1 = vcmask 261120   ;;  %s172_s24 = smov [#allocation2]   ;;  %vm101_vm2 = vcmask 130048  }
   0x4   :  { %137 = vmatpush3.bf16.msra.mxu0 %v136_v4  ;;  %v117_v9 = vld [vmem:[%s225_s2] ss:$0 sm:$0xff]  ;;  %s109_s1 = sshll.u32 %s172_s24, 4  ;;  %s110_s1 = int_to_ptr.vmem [resolvable:$true] %s109_s1 }
   0x5   :  { %138 = vmatprep.subr.bf16.mxu0 %v169_v3  ;;  %s145_s25 = scalar_lea.vmem %s110_s1, 128  ;;  %p150_p1 = scmp.lt.s32.totalorder %s110_s1, %s110_s1 }
   0x6   :  { %p146_p0 = scmp.ne.s32.totalorder %s110_s1, %s145_s25  ;;  %p151_p2 = scmp.lt.s32.totalorder %s145_s25, %s145_s25 }
   0x8   :  { %140 = vmatpush3.bf16.msra.mxu0 %v139_v7  ;;  %p152_p3 = por %p151_p2, %p150_p1 }
   0xa   :  { %p153_p4 = pnand %p152_p3, %p146_p0 }
   0xb   :  { %133 = vmatmul.mubr.msk.f32.vlgmr.msra.gmra.mrb[0].mxu0 %vm27_vm1, %v15_v8 }
  0xde   :  { %v97_v10 = vpop.f32.mrb[0].mxu0 }
  0xdf   :  { %v98_v11 = vadd.f32 %v117_v9, %v97_v10  ;;  %v134_v12 = vpop.f32.mrb[1].mxu0 }
  0xe1   :  { %102 = vst.msk [vmem:[#allocation2] sm:$0xff] %vm101_vm2, %v98_v11 }
  0xe2   :  { %156 = shalt.err (!%p153_p4)
}
  0xe3   :  { %s157_s27 = scalar_lea.hbm %s226_s3, 128 }
  0xe4   :  { %p158_p5 = scmp.ne.s32.totalorder %s226_s3, %s157_s27  ;;  %p161_p6 = scmp.lt.u32.totalorder %s157_s27, %s226_s3 }
  0xe6   :  { %p163_p7 = pnand %p161_p6, %p158_p5 }
  0xe8   :  { %166 = shalt.err (!%p163_p7)
}
  0xe9   :  { %112 = dma.vmem_to_hbm [thread:$0]  %s110_s1, 128, %s226_s3, [#allocation3]  }
  0xea   :  { %167 = dma.done.wait [#allocation3], 128  }
  0xeb   :  { %168 = vsyncadd [#allocation3], 4294967168 }
  0xec   :  { %116 = vsyncpa [#allocation3], 1 }

</bundles_post_ra>
